<compile_context>
chip_gen: v5e
topology: v5e:2x2
jax: 0.10.0
libtpu: 0.0.40
codegen_flags: <defaults>
</compile_context>

<pallas_src>
import jax
import jax.numpy as jnp
from jax.experimental import pallas as pl
from jax.experimental.pallas import tpu as pltpu


def audio_projector_kernel(
    x_ref,      # [Bt, S, E]   unnormalized embeddings
    mask_ref,   # [Bt, 1, S]   additive key-padding mask (0 / -1e30), f32
    gamma_ref,  # [1, E]       LayerNorm weight
    beta_ref,   # [1, E]       LayerNorm bias
    wq_ref,     # [E, E]       Wq^T with 1/sqrt(E) folded in (mxu dtype)
    wk_ref,     # [E, E]       Wk^T
    wv_ref,     # [E, E]       Wv^T
    wo_ref,     # [E, E]       out_proj^T
    alpha_ref,  # [1, 1]       PReLU slope
    wl_ref,     # [E, Opad]    final Linear^T, zero-padded to 128-lane multiple
    bl_ref,     # [1, Opad]    final Linear bias, zero-padded
    out_ref,    # [1, Bt, Opad]
):
    Bt, S, E = x_ref.shape
    eps = 1e-5
    mxu_dtype = wq_ref.dtype   # bf16 fast path / f32 exact path

    # ---- LayerNorm over the feature axis (f32 VPU math) ----
    x = x_ref[...].astype(jnp.float32).reshape(Bt * S, E)
    mu = jnp.mean(x, axis=-1, keepdims=True)
    xc = x - mu
    var = jnp.mean(xc * xc, axis=-1, keepdims=True)
    y = xc * jax.lax.rsqrt(var + eps) * gamma_ref[...] + beta_ref[...]   # [Bt*S, E]

    # ---- Q/K/V projections: three lane-aligned dots (scale folded in Wq) ----
    # TODO(synk): for real wav2vec2 (E=768, E % 128 == 0) fuse these into one
    #             [E, 3E] dot and slice on lane-tile boundaries instead.
    yb = y.astype(mxu_dtype)
    q = jnp.dot(yb, wq_ref[...], preferred_element_type=jnp.float32).reshape(Bt, S, E)
    k = jnp.dot(yb, wk_ref[...], preferred_element_type=jnp.float32).reshape(Bt, S, E)
    v = jnp.dot(yb, wv_ref[...], preferred_element_type=jnp.float32).reshape(Bt, S, E)

    # ---- attention scores + precomputed additive key-padding mask ----
    s = jnp.einsum("bqe,bke->bqk", q.astype(mxu_dtype), k.astype(mxu_dtype),
                   preferred_element_type=jnp.float32)        # [Bt, S, S]
    s = s + mask_ref[...]                                     # bcast over queries

    # ---- softmax (f32); denominator reciprocal goes to the EUP ----
    m = jnp.max(s, axis=-1, keepdims=True)
    p = jnp.exp(s - m)
    attn = p * pl.reciprocal(jnp.sum(p, axis=-1, keepdims=True), approx=True)

    # ---- pool over queries BEFORE attn@V and out-proj (mean is linear) ----
    w = jnp.mean(attn, axis=1, keepdims=True)                 # [Bt, 1, S]
    pooled = jnp.einsum("bqs,bse->bqe", w.astype(mxu_dtype), v.astype(mxu_dtype),
                        preferred_element_type=jnp.float32)[:, 0, :]      # [Bt, E]
    pooled = jnp.dot(pooled.astype(mxu_dtype), wo_ref[...],
                     preferred_element_type=jnp.float32)

    # ---- PReLU + final Linear (lane-padded N -> unmasked full-lane store) ----
    a = alpha_ref[0, 0]
    pooled = jnp.where(pooled >= 0, pooled, a * pooled)
    out = jnp.dot(pooled.astype(mxu_dtype), wl_ref[...],
                  preferred_element_type=jnp.float32) + bl_ref[...]       # [Bt, Opad]
    out_ref[0] = out.astype(out_ref.dtype)


def _default_block_b(batch):
    """Generation-aware batch tile.

    v7x has 2 TensorCores per chip -> keep >= 2 (even) grid steps so the
    "parallel" batch axis shards across both cores. Single-TC v5e/v6e do the
    whole batch in one grid step (extra steps are pure serial overhead,
    ~0.35us / ~600 cycles each, which dominates at these shapes).
    """
    try:
        kind = jax.devices()[0].device_kind.lower()
    except Exception:
        kind = ""
    if "v7" in kind and batch % 2 == 0 and batch >= 2:
        return batch // 2
    return batch


def audio_projector(x, lengths, params, *, block_b=None, mxu_dtype=jnp.bfloat16):
    """x: [B, S, E] f32, lengths: [B] int -> [B, O] f32."""
    B, S, E = x.shape
    O = params["wl"].shape[0]
    if block_b is None:
        block_b = _default_block_b(B)
    assert B % block_b == 0, "batch must be divisible by block_b"
    nb = B // block_b

    # One-time parameter prep outside the kernel: pre-transpose, fold the
    # 1/sqrt(E) softmax scale into Wq, cast MXU operands to bf16 (f32 accum
    # happens in-kernel), and zero-pad the output feature dim to a 128-lane
    # multiple so the last matmul and the result store are lane-dense.
    scale = 1.0 / jnp.sqrt(jnp.float32(E))
    wq_t = (params["wq"].T * scale).astype(mxu_dtype)
    wk_t = params["wk"].T.astype(mxu_dtype)
    wv_t = params["wv"].T.astype(mxu_dtype)
    wo_t = params["wo"].T.astype(mxu_dtype)
    o_pad = -(-O // 128) * 128
    wl_t = jnp.pad(params["wl"].T, ((0, 0), (0, o_pad - O))).astype(mxu_dtype)
    bl_p = jnp.pad(params["bl"], ((0, 0), (0, o_pad - O))).astype(jnp.float32)

    # Additive key-padding mask precomputed in plain JAX (replaces scalar
    # prefetch + in-kernel SMEM loop). Finite -1e30 avoids -inf -> NaN.
    pos = jnp.arange(S, dtype=jnp.int32)[None, None, :]
    kmask = jnp.where(pos < lengths.astype(jnp.int32)[:, None, None],
                      0.0, -1e30).astype(jnp.float32)          # [B, 1, S]

    const2 = lambda b: (0, 0)

    # TODO(synk): at real wav2vec2 sizes (S~500, E=768) re-derive block_b and
    #             vmem_limit_bytes per generation (v7x has only 64 MiB VMEM vs
    #             128 MiB on v5e/v6e), and single-buffer the constant-index
    #             weight specs (pipeline_mode=pl.Buffered(1)) — irrelevant at
    #             E=32 so left at the defaults here.
    out = pl.pallas_call(
        audio_projector_kernel,
        out_shape=jax.ShapeDtypeStruct((nb, block_b, o_pad), jnp.float32),
        grid=(nb,),
        in_specs=[
            pl.BlockSpec((block_b, S, E), lambda b: (b, 0, 0)),    # x
            pl.BlockSpec((block_b, 1, S), lambda b: (b, 0, 0)),    # key mask
            pl.BlockSpec((1, E), const2),                          # gamma
            pl.BlockSpec((1, E), const2),                          # beta
            pl.BlockSpec((E, E), const2),                          # Wq^T * scale
            pl.BlockSpec((E, E), const2),                          # Wk^T
            pl.BlockSpec((E, E), const2),                          # Wv^T
            pl.BlockSpec((E, E), const2),                          # Wo^T
            pl.BlockSpec((1, 1), const2),                          # PReLU alpha
            pl.BlockSpec((E, o_pad), const2),                      # Wl^T (padded)
            pl.BlockSpec((1, o_pad), const2),                      # bl (padded)
        ],
        out_specs=pl.BlockSpec((1, block_b, o_pad), lambda b: (b, 0, 0)),
        compiler_params=pltpu.CompilerParams(
            dimension_semantics=("parallel",),       # batch blocks -> v7x dual TC
            vmem_limit_bytes=32 * 1024 * 1024,       # safe on v5e/v6e/v7x
        ),
    )(x, kmask, params["gamma"], params["beta"], wq_t, wk_t, wv_t, wo_t,
      params["alpha"], wl_t, bl_p)
    return out.reshape(B, o_pad)[:, :O]


def audio_projector_ref(x, lengths, params):
    """Pure-JAX reference mirroring the PyTorch forward (all f32)."""
    B, S, E = x.shape
    pos = jnp.arange(S)[None, :]
    valid = pos < lengths[:, None]                           # [B, S]
    kbias = jnp.where(valid, 0.0, -jnp.inf)[:, None, :]      # [B, 1, S]

    mu = jnp.mean(x, axis=-1, keepdims=True)
    var = jnp.mean((x - mu) ** 2, axis=-1, keepdims=True)
    y = (x - mu) / jnp.sqrt(var + 1e-5) * params["gamma"][0] + params["beta"][0]

    q = y @ params["wq"].T
    k = y @ params["wk"].T
    v = y @ params["wv"].T
    s = jnp.einsum("bqe,bke->bqk", q, k) / jnp.sqrt(jnp.float32(E)) + kbias
    attn = jax.nn.softmax(s, axis=-1)
    o = jnp.einsum("bqk,bke->bqe", attn, v) @ params["wo"].T
    pooled = jnp.mean(o, axis=1)                             # [B, E]
    a = params["alpha"][0, 0]
    pooled = jnp.where(pooled >= 0, pooled, a * pooled)
    return pooled @ params["wl"].T + params["bl"][0]


if __name__ == "__main__":
    B, S = 4, 8
    E = O = 32   # in_features == out_features (required by the original forward)

    key = jax.random.PRNGKey(0)
    kx, kq, kk, kv, ko, kl, kb = jax.random.split(key, 7)

    x = jax.random.normal(kx, (B, S, E), jnp.float32)
    lengths = jnp.array([S, 5, 8, 3], dtype=jnp.int32)       # max length == S

    params = dict(
        gamma=jnp.ones((1, E), jnp.float32),                 # LayerNorm defaults
        beta=jnp.zeros((1, E), jnp.float32),
        wq=0.1 * jax.random.normal(kq, (E, E), jnp.float32),
        wk=0.1 * jax.random.normal(kk, (E, E), jnp.float32),
        wv=0.1 * jax.random.normal(kv, (E, E), jnp.float32),
        wo=0.1 * jax.random.normal(ko, (E, E), jnp.float32),
        alpha=jnp.full((1, 1), 0.25, jnp.float32),           # PReLU default init
        wl=0.1 * jax.random.normal(kl, (O, E), jnp.float32),
        bl=0.01 * jax.random.normal(kb, (1, O), jnp.float32),
    )

    # Exact path (f32 MXU operands) -> tight tolerance vs. the f32 reference.
    out_f32 = jax.block_until_ready(
        audio_projector(x, lengths, params, mxu_dtype=jnp.float32))
    # Fast path (bf16 MXU operands, f32 accumulation) -> looser tolerance:
    # bf16 operand rounding + EUP approx reciprocal + reordered (linear)
    # mean-pool / matmul reductions.
    out_bf16 = jax.block_until_ready(audio_projector(x, lengths, params))

    ref = audio_projector_ref(x, lengths, params)
    assert out_f32.shape == (B, O), out_f32.shape
    assert out_bf16.shape == (B, O), out_bf16.shape
    assert jnp.allclose(out_f32, ref, rtol=1e-3, atol=1e-3), \
        jnp.abs(out_f32 - ref).max()
    assert jnp.allclose(out_bf16, ref, rtol=3e-2, atol=3e-2), \
        jnp.abs(out_bf16 - ref).max()
    print("KERNEL_OK")
</pallas_src>

<mosaic_0001>
module attributes {stable_mosaic.version = 11 : i64} {
  func.func @audio_projector_kernel(%arg0: i32, %arg1: memref<4x8x32xf32, #tpu.memory_space<vmem>>, %arg2: memref<4x1x8xf32, #tpu.memory_space<vmem>>, %arg3: memref<1x32xf32, #tpu.memory_space<vmem>>, %arg4: memref<1x32xf32, #tpu.memory_space<vmem>>, %arg5: memref<32x32xf32, #tpu.memory_space<vmem>>, %arg6: memref<32x32xf32, #tpu.memory_space<vmem>>, %arg7: memref<32x32xf32, #tpu.memory_space<vmem>>, %arg8: memref<32x32xf32, #tpu.memory_space<vmem>>, %arg9: memref<1x1xf32, #tpu.memory_space<vmem>>, %arg10: memref<32x128xf32, #tpu.memory_space<vmem>>, %arg11: memref<1x128xf32, #tpu.memory_space<vmem>>, %arg12: memref<1x4x128xf32, #tpu.memory_space<vmem>>) attributes {dimension_semantics = [#tpu.dimension_semantics<parallel>], iteration_bounds = array<i64: 1>, scalar_prefetch = 0 : i64, scratch_operands = 0 : i64, tpu.core_type = #tpu.core_type<tc>, window_params = [{transform_indices = @transform_0, window_bounds = array<i64: 4, 8, 32>}, {transform_indices = @transform_1, window_bounds = array<i64: 4, 1, 8>}, {pipeline_mode = #tpu.pipeline_mode<synchronous>, transform_indices = @transform_2, window_bounds = array<i64: 1, 32>}, {pipeline_mode = #tpu.pipeline_mode<synchronous>, transform_indices = @transform_3, window_bounds = array<i64: 1, 32>}, {pipeline_mode = #tpu.pipeline_mode<synchronous>, transform_indices = @transform_4, window_bounds = array<i64: 32, 32>}, {pipeline_mode = #tpu.pipeline_mode<synchronous>, transform_indices = @transform_5, window_bounds = array<i64: 32, 32>}, {pipeline_mode = #tpu.pipeline_mode<synchronous>, transform_indices = @transform_6, window_bounds = array<i64: 32, 32>}, {pipeline_mode = #tpu.pipeline_mode<synchronous>, transform_indices = @transform_7, window_bounds = array<i64: 32, 32>}, {pipeline_mode = #tpu.pipeline_mode<synchronous>, transform_indices = @transform_8, window_bounds = array<i64: 1, 1>}, {pipeline_mode = #tpu.pipeline_mode<synchronous>, transform_indices = @transform_9, window_bounds = array<i64: 32, 128>}, {pipeline_mode = #tpu.pipeline_mode<synchronous>, transform_indices = @transform_10, window_bounds = array<i64: 1, 128>}, {transform_indices = @transform_11, window_bounds = array<i64: 1, 4, 128>}]} {
    %c0 = arith.constant 0 : index
    %c0_0 = arith.constant 0 : index
    %c0_1 = arith.constant 0 : index
    %0 = vector.load %arg1[%c0, %c0_0, %c0_1] : memref<4x8x32xf32, #tpu.memory_space<vmem>>, vector<4x8x32xf32>
    %1 = vector.shape_cast %0 : vector<4x8x32xf32> to vector<32x32xf32>
    %cst = arith.constant dense<0.000000e+00> : vector<32xf32>
    %2 = vector.multi_reduction <add>, %1, %cst [1] : vector<32x32xf32> to vector<32xf32>
    %3 = vector.shape_cast %2 : vector<32xf32> to vector<32x1xf32>
    %cst_2 = arith.constant 3.200000e+01 : f32
    %4 = vector.broadcast %cst_2 : f32 to vector<32x1xf32>
    %5 = arith.divf %3, %4 : vector<32x1xf32>
    %6 = vector.broadcast %5 : vector<32x1xf32> to vector<32x32xf32>
    %7 = arith.subf %1, %6 : vector<32x32xf32>
    %8 = arith.mulf %7, %7 : vector<32x32xf32>
    %cst_3 = arith.constant dense<0.000000e+00> : vector<32xf32>
    %9 = vector.multi_reduction <add>, %8, %cst_3 [1] : vector<32x32xf32> to vector<32xf32>
    %10 = vector.shape_cast %9 : vector<32xf32> to vector<32x1xf32>
    %cst_4 = arith.constant 3.200000e+01 : f32
    %11 = vector.broadcast %cst_4 : f32 to vector<32x1xf32>
    %12 = arith.divf %10, %11 : vector<32x1xf32>
    %cst_5 = arith.constant 9.99999974E-6 : f32
    %13 = vector.broadcast %cst_5 : f32 to vector<32x1xf32>
    %14 = arith.addf %12, %13 : vector<32x1xf32>
    %15 = math.rsqrt %14 : vector<32x1xf32>
    %16 = vector.broadcast %15 : vector<32x1xf32> to vector<32x32xf32>
    %17 = arith.mulf %7, %16 : vector<32x32xf32>
    %c0_6 = arith.constant 0 : index
    %c0_7 = arith.constant 0 : index
    %18 = vector.load %arg3[%c0_6, %c0_7] : memref<1x32xf32, #tpu.memory_space<vmem>>, vector<1x32xf32>
    %19 = vector.broadcast %18 : vector<1x32xf32> to vector<32x32xf32>
    %20 = arith.mulf %17, %19 : vector<32x32xf32>
    %c0_8 = arith.constant 0 : index
    %c0_9 = arith.constant 0 : index
    %21 = vector.load %arg4[%c0_8, %c0_9] : memref<1x32xf32, #tpu.memory_space<vmem>>, vector<1x32xf32>
    %22 = vector.broadcast %21 : vector<1x32xf32> to vector<32x32xf32>
    %23 = arith.addf %20, %22 : vector<32x32xf32>
    %c0_10 = arith.constant 0 : index
    %c0_11 = arith.constant 0 : index
    %24 = vector.load %arg5[%c0_10, %c0_11] : memref<32x32xf32, #tpu.memory_space<vmem>>, vector<32x32xf32>
    %cst_12 = arith.constant dense<0.000000e+00> : vector<32x32xf32>
    %25 = tpu.matmul %23, %24, %cst_12 {dimension_numbers = #tpu.dot_dimension_numbers<[1], [0], [0], [1], [0, 0, 1, 1], [], []>} : vector<32x32xf32>, vector<32x32xf32>, vector<32x32xf32> -> vector<32x32xf32>
    %26 = vector.shape_cast %25 : vector<32x32xf32> to vector<4x8x32xf32>
    %c0_13 = arith.constant 0 : index
    %c0_14 = arith.constant 0 : index
    %27 = vector.load %arg6[%c0_13, %c0_14] : memref<32x32xf32, #tpu.memory_space<vmem>>, vector<32x32xf32>
    %cst_15 = arith.constant dense<0.000000e+00> : vector<32x32xf32>
    %28 = tpu.matmul %23, %27, %cst_15 {dimension_numbers = #tpu.dot_dimension_numbers<[1], [0], [0], [1], [0, 0, 1, 1], [], []>} : vector<32x32xf32>, vector<32x32xf32>, vector<32x32xf32> -> vector<32x32xf32>
    %29 = vector.shape_cast %28 : vector<32x32xf32> to vector<4x8x32xf32>
    %c0_16 = arith.constant 0 : index
    %c0_17 = arith.constant 0 : index
    %30 = vector.load %arg7[%c0_16, %c0_17] : memref<32x32xf32, #tpu.memory_space<vmem>>, vector<32x32xf32>
    %cst_18 = arith.constant dense<0.000000e+00> : vector<32x32xf32>
    %31 = tpu.matmul %23, %30, %cst_18 {dimension_numbers = #tpu.dot_dimension_numbers<[1], [0], [0], [1], [0, 0, 1, 1], [], []>} : vector<32x32xf32>, vector<32x32xf32>, vector<32x32xf32> -> vector<32x32xf32>
    %32 = vector.shape_cast %31 : vector<32x32xf32> to vector<4x8x32xf32>
    "tpu.trace_start"() <{level = 10 : i32, message = "bqe,bke->bqk"}> : () -> ()
    %cst_19 = arith.constant dense<0.000000e+00> : vector<4x8x8xf32>
    %33 = tpu.matmul %26, %29, %cst_19 {dimension_numbers = #tpu.dot_dimension_numbers<[2], [2], [1], [1], [0, 0, 0, 1, 1, 1], [0], [0]>} : vector<4x8x32xf32>, vector<4x8x32xf32>, vector<4x8x8xf32> -> vector<4x8x8xf32>
    "tpu.trace_stop"() : () -> ()
    %c0_20 = arith.constant 0 : index
    %c0_21 = arith.constant 0 : index
    %c0_22 = arith.constant 0 : index
    %34 = vector.load %arg2[%c0_20, %c0_21, %c0_22] : memref<4x1x8xf32, #tpu.memory_space<vmem>>, vector<4x1x8xf32>
    %35 = vector.broadcast %34 : vector<4x1x8xf32> to vector<4x8x8xf32>
    %36 = arith.addf %33, %35 : vector<4x8x8xf32>
    %cst_23 = arith.constant dense<0xFF800000> : vector<4x8xf32>
    %37 = vector.multi_reduction <maximumf>, %36, %cst_23 [2] : vector<4x8x8xf32> to vector<4x8xf32>
    %38 = vector.shape_cast %37 : vector<4x8xf32> to vector<4x8x1xf32>
    %39 = vector.broadcast %38 : vector<4x8x1xf32> to vector<4x8x8xf32>
    %40 = arith.subf %36, %39 : vector<4x8x8xf32>
    %41 = math.exp %40 : vector<4x8x8xf32>
    %cst_24 = arith.constant dense<0.000000e+00> : vector<4x8xf32>
    %42 = vector.multi_reduction <add>, %41, %cst_24 [2] : vector<4x8x8xf32> to vector<4x8xf32>
    %43 = vector.shape_cast %42 : vector<4x8xf32> to vector<4x8x1xf32>
    %44 = tpu.reciprocal %43 {approx = true} : vector<4x8x1xf32> -> vector<4x8x1xf32>
    %45 = vector.broadcast %44 : vector<4x8x1xf32> to vector<4x8x8xf32>
    %46 = arith.mulf %41, %45 : vector<4x8x8xf32>
    %cst_25 = arith.constant dense<0.000000e+00> : vector<4x8xf32>
    %47 = vector.multi_reduction <add>, %46, %cst_25 [1] : vector<4x8x8xf32> to vector<4x8xf32>
    %48 = vector.shape_cast %47 : vector<4x8xf32> to vector<4x1x8xf32>
    %cst_26 = arith.constant 8.000000e+00 : f32
    %49 = vector.broadcast %cst_26 : f32 to vector<4x1x8xf32>
    %50 = arith.divf %48, %49 : vector<4x1x8xf32>
    "tpu.trace_start"() <{level = 10 : i32, message = "bqs,bse->bqe"}> : () -> ()
    %cst_27 = arith.constant dense<0.000000e+00> : vector<4x1x32xf32>
    %51 = tpu.matmul %50, %32, %cst_27 {dimension_numbers = #tpu.dot_dimension_numbers<[2], [1], [1], [2], [0, 0, 0, 1, 1, 2], [0], [0]>} : vector<4x1x8xf32>, vector<4x8x32xf32>, vector<4x1x32xf32> -> vector<4x1x32xf32>
    "tpu.trace_stop"() : () -> ()
    %52 = vector.shape_cast %51 : vector<4x1x32xf32> to vector<4x32xf32>
    %c0_28 = arith.constant 0 : index
    %c0_29 = arith.constant 0 : index
    %53 = vector.load %arg8[%c0_28, %c0_29] : memref<32x32xf32, #tpu.memory_space<vmem>>, vector<32x32xf32>
    %cst_30 = arith.constant dense<0.000000e+00> : vector<4x32xf32>
    %54 = tpu.matmul %52, %53, %cst_30 {dimension_numbers = #tpu.dot_dimension_numbers<[1], [0], [0], [1], [0, 0, 1, 1], [], []>} : vector<4x32xf32>, vector<32x32xf32>, vector<4x32xf32> -> vector<4x32xf32>
    %c0_31 = arith.constant 0 : index
    %c0_32 = arith.constant 0 : index
    %55 = vector.load %arg9[%c0_31, %c0_32] : memref<1x1xf32, #tpu.memory_space<vmem>>, vector<1x1xf32>
    %56 = vector.extract %55[0, 0] : f32 from vector<1x1xf32>
    %cst_33 = arith.constant 0.000000e+00 : f32
    %57 = vector.broadcast %cst_33 : f32 to vector<4x32xf32>
    %58 = arith.cmpf oge, %54, %57 : vector<4x32xf32>
    %59 = vector.broadcast %56 : f32 to vector<4x32xf32>
    %60 = arith.mulf %59, %54 : vector<4x32xf32>
    %61 = arith.select %58, %54, %60 : vector<4x32xi1>, vector<4x32xf32>
    %c0_34 = arith.constant 0 : index
    %c0_35 = arith.constant 0 : index
    %62 = vector.load %arg10[%c0_34, %c0_35] : memref<32x128xf32, #tpu.memory_space<vmem>>, vector<32x128xf32>
    %cst_36 = arith.constant dense<0.000000e+00> : vector<4x128xf32>
    %63 = tpu.matmul %61, %62, %cst_36 {dimension_numbers = #tpu.dot_dimension_numbers<[1], [0], [0], [1], [0, 0, 1, 1], [], []>} : vector<4x32xf32>, vector<32x128xf32>, vector<4x128xf32> -> vector<4x128xf32>
    %c0_37 = arith.constant 0 : index
    %c0_38 = arith.constant 0 : index
    %64 = vector.load %arg11[%c0_37, %c0_38] : memref<1x128xf32, #tpu.memory_space<vmem>>, vector<1x128xf32>
    %65 = vector.broadcast %64 : vector<1x128xf32> to vector<4x128xf32>
    %66 = arith.addf %63, %65 : vector<4x128xf32>
    %c0_39 = arith.constant 0 : index
    %c0_40 = arith.constant 0 : index
    %c0_41 = arith.constant 0 : index
    %67 = vector.load %arg12[%c0_39, %c0_40, %c0_41] : memref<1x4x128xf32, #tpu.memory_space<vmem>>, vector<1x4x128xf32>
    %68 = vector.shape_cast %67 : vector<1x4x128xf32> to vector<4x128xf32>
    %69 = vector.shape_cast %66 : vector<4x128xf32> to vector<1x4x128xf32>
    tpu.vector_store %arg12[%c0_39, %c0_40, %c0_41], %69 {strides = array<i32>} : memref<1x4x128xf32, #tpu.memory_space<vmem>>, vector<1x4x128xf32>,
    return
  }
  func.func @transform_0(%arg0: i32) -> (i32, i32, i32) {
    %c0_i32 = arith.constant 0 : i32
    %c0_i32_0 = arith.constant 0 : i32
    %c0_i32_1 = arith.constant 0 : i32
    return %arg0, %c0_i32, %c0_i32_0 : i32, i32, i32
  }
  func.func @transform_1(%arg0: i32) -> (i32, i32, i32) {
    %c0_i32 = arith.constant 0 : i32
    %c0_i32_0 = arith.constant 0 : i32
    %c0_i32_1 = arith.constant 0 : i32
    return %arg0, %c0_i32, %c0_i32_0 : i32, i32, i32
  }
  func.func @transform_2(%arg0: i32) -> (i32, i32) {
    %c0_i32 = arith.constant 0 : i32
    %c0_i32_0 = arith.constant 0 : i32
    %c0_i32_1 = arith.constant 0 : i32
    return %c0_i32, %c0_i32_0 : i32, i32
  }
  func.func @transform_3(%arg0: i32) -> (i32, i32) {
    %c0_i32 = arith.constant 0 : i32
    %c0_i32_0 = arith.constant 0 : i32
    %c0_i32_1 = arith.constant 0 : i32
    return %c0_i32, %c0_i32_0 : i32, i32
  }
  func.func @transform_4(%arg0: i32) -> (i32, i32) {
    %c0_i32 = arith.constant 0 : i32
    %c0_i32_0 = arith.constant 0 : i32
    %c0_i32_1 = arith.constant 0 : i32
    return %c0_i32, %c0_i32_0 : i32, i32
  }
  func.func @transform_5(%arg0: i32) -> (i32, i32) {
    %c0_i32 = arith.constant 0 : i32
    %c0_i32_0 = arith.constant 0 : i32
    %c0_i32_1 = arith.constant 0 : i32
    return %c0_i32, %c0_i32_0 : i32, i32
  }
  func.func @transform_6(%arg0: i32) -> (i32, i32) {
    %c0_i32 = arith.constant 0 : i32
    %c0_i32_0 = arith.constant 0 : i32
    %c0_i32_1 = arith.constant 0 : i32
    return %c0_i32, %c0_i32_0 : i32, i32
  }
  func.func @transform_7(%arg0: i32) -> (i32, i32) {
    %c0_i32 = arith.constant 0 : i32
    %c0_i32_0 = arith.constant 0 : i32
    %c0_i32_1 = arith.constant 0 : i32
    return %c0_i32, %c0_i32_0 : i32, i32
  }
  func.func @transform_8(%arg0: i32) -> (i32, i32) {
    %c0_i32 = arith.constant 0 : i32
    %c0_i32_0 = arith.constant 0 : i32
    %c0_i32_1 = arith.constant 0 : i32
    return %c0_i32, %c0_i32_0 : i32, i32
  }
  func.func @transform_9(%arg0: i32) -> (i32, i32) {
    %c0_i32 = arith.constant 0 : i32
    %c0_i32_0 = arith.constant 0 : i32
    %c0_i32_1 = arith.constant 0 : i32
    return %c0_i32, %c0_i32_0 : i32, i32
  }
  func.func @transform_10(%arg0: i32) -> (i32, i32) {
    %c0_i32 = arith.constant 0 : i32
    %c0_i32_0 = arith.constant 0 : i32
    %c0_i32_1 = arith.constant 0 : i32
    return %c0_i32, %c0_i32_0 : i32, i32
  }
  func.func @transform_11(%arg0: i32) -> (i32, i32, i32) {
    %c0_i32 = arith.constant 0 : i32
    %c0_i32_0 = arith.constant 0 : i32
    %c0_i32_1 = arith.constant 0 : i32
    return %arg0, %c0_i32, %c0_i32_0 : i32, i32, i32
  }
}

</mosaic_0001>

<bundles_post_ra>
// kernel: tpu_custom_call.1
= control target key start
LH: loop header
LB: loop body
LE: loop exit
PB: predicated region body
PF: predicated region fallthrough
CT: control target
= control target key end

     0   :  { %s1249_s0 = inlined_call_operand.hbm [shape: f32[4,8,32], index: 0, kind: input, shape index: {}]   ;;  %s1250_s1 = inlined_call_operand.hbm [shape: f32[4,1,8], index: 1, kind: input, shape index: {}]   ;;  %s1251_s2 = inlined_call_operand.vmem [shape: f32[1,32], index: 2, kind: input, shape index: {}]   ;;  %s1252_s3 = inlined_call_operand.vmem [shape: f32[1,32], index: 3, kind: input, shape index: {}]   ;;  %s1253_s4 = inlined_call_operand.hbm [shape: f32[32,32], index: 4, kind: input, shape index: {}]   ;;  %s1254_s5 = inlined_call_operand.hbm [shape: f32[32,32], index: 5, kind: input, shape index: {}]   ;;  %s1255_s6 = inlined_call_operand.hbm [shape: f32[32,32], index: 6, kind: input, shape index: {}]   ;;  %s1256_s7 = inlined_call_operand.hbm [shape: f32[32,32], index: 7, kind: input, shape index: {}]   ;;  %s1257_s8 = inlined_call_operand.<no memory space> [shape: f32[1,1], index: 8, kind: input, shape index: {}]   ;;  %s1258_s9 = inlined_call_operand.hbm [shape: f32[32,128], index: 9, kind: input, shape index: {}]   ;;  %s1259_s10 = inlined_call_operand.vmem [shape: f32[1,128], index: 10, kind: input, shape index: {}]   ;;  %s1260_s11 = inlined_call_operand.hbm [shape: f32[1,4,128], index: 11, kind: output, shape index: {}]  }
   0x1   :  { %v16_v0 = vstv %s1257_s8 }
   0x2   :  { %17 = vst [vmem:[#allocation2] sm:$0x1] %v16_v0 }
   0x3   :  { %18 = vsyncpa [#allocation4], 0 }
   0x4   :  { %19 = vsyncpa [#allocation7], 0 }
   0x5   :  { %20 = vsyncpa [#allocation10], 0 }
   0x6   :  { %21 = vsyncpa [#allocation13], 0  ;;  %s40_s21 = sshll.u32 %s1250_s1, 4  ;;  %s41_s21 = int_to_ptr.hbm [resolvable:$true] %s40_s21 }
   0x7   :  { %22 = vsyncpa [#allocation5], 0  ;;  %s1049_s22 = smov [#allocation6]   ;;  %s1050_s24 = smov 16  }
   0x8   :  { %s42_s23 = sshll.u32 %s1049_s22, 4  ;;  %s1051_s25 = smov 1   ;;  %s43_s23 = int_to_ptr.vmem [resolvable:$true] %s42_s23 }
   0x9   :  { %48 = dma.hbm_to_vmem [thread:$0]  %s41_s21, 64, %s43_s23, [#allocation7], %s1050_s24, %s1050_s24, %s1051_s25  }
   0xa   :  { %s70_s8 = sshll.u32 %s1254_s5, 4  ;;  %s1052_s28 = smov [#allocation9]   ;;  %s71_s8 = int_to_ptr.hbm [resolvable:$true] %s70_s8 }
   0xb   :  { %s72_s29 = sshll.u32 %s1052_s28, 4  ;;  %s96_s13 = sshll.u32 %s1256_s7, 4  ;;  %s73_s29 = int_to_ptr.vmem [resolvable:$true] %s72_s29  ;;  %s97_s13 = int_to_ptr.hbm [resolvable:$true] %s96_s13 }
   0xc   :  { %s1053_s1 = smov 128   ;;  %s1054_s14 = smov 8  }
   0xd   :  { %78 = dma.hbm_to_vmem [thread:$0]  %s71_s8, 512, %s73_s29, [#allocation10], %s1053_s1, %s1053_s1, %s1054_s14  }
   0xe   :  { %s27_s17 = sshll.u32 %s1249_s0, 4  ;;  %s1055_s5 = smov [#allocation12]   ;;  %s28_s17 = int_to_ptr.hbm [resolvable:$true] %s27_s17 }
   0xf   :  { %s98_s18 = sshll.u32 %s1055_s5, 4  ;;  %s1056_s7 = smov [#allocation3]   ;;  %s99_s18 = int_to_ptr.vmem [resolvable:$true] %s98_s18 }
  0x10   :  { %104 = dma.hbm_to_vmem [thread:$0]  %s97_s13, 512, %s99_s18, [#allocation13], %s1053_s1, %s1053_s1, %s1054_s14  }
  0x11   :  { %s29_s19 = sshll.u32 %s1056_s7, 4  ;;  %s57_s22 = sshll.u32 %s1253_s4, 4  ;;  %s30_s19 = int_to_ptr.vmem [resolvable:$true] %s29_s19  ;;  %s58_s22 = int_to_ptr.hbm [resolvable:$true] %s57_s22 }
  0x12   :  { %35 = dma.hbm_to_vmem [thread:$0]  %s28_s17, 512, %s30_s19, [#allocation4], %s1053_s1, %s1053_s1, %s1054_s14  }
  0x13   :  { %s83_s24 = sshll.u32 %s1255_s6, 4  ;;  %s1057_s25 = smov [#allocation8]   ;;  %s84_s24 = int_to_ptr.hbm [resolvable:$true] %s83_s24 }
  0x14   :  { %s59_s26 = sshll.u32 %s1057_s25, 4  ;;  %s1058_s27 = smov [#allocation11]   ;;  %s60_s26 = int_to_ptr.vmem [resolvable:$true] %s59_s26 }
  0x15   :  { %65 = dma.hbm_to_vmem [thread:$0]  %s58_s22, 512, %s60_s26, [#allocation7], %s1053_s1, %s1053_s1, %s1054_s14  }
  0x16   :  { %s85_s4 = sshll.u32 %s1058_s27, 4  ;;  %s111_s29 = sshll.u32 %s1258_s9, 4  ;;  %s86_s4 = int_to_ptr.vmem [resolvable:$true] %s85_s4  ;;  %s112_s29 = int_to_ptr.hbm [resolvable:$true] %s111_s29 }
  0x17   :  { %91 = dma.hbm_to_vmem [thread:$0]  %s84_s24, 512, %s86_s4, [#allocation10], %s1053_s1, %s1053_s1, %s1054_s14  }
  0x18   :  { %s1059_s6 = smov [#allocation14]  }
  0x19   :  { %s113_s30 = sshll.u32 %s1059_s6, 4  ;;  %s114_s30 = int_to_ptr.vmem [resolvable:$true] %s113_s30 }
  0x1a   :  { %119 = dma.hbm_to_vmem [thread:$0]  %s112_s29, 512, %s114_s30, [#allocation13], %s1053_s1, %s1053_s1, %s1054_s14  }
  0x1b   :  { %1039 = dma.done.wait [#allocation4], 512  }
  0x1c   :  { %1040 = vsyncadd [#allocation4], 4294966784 }
  0x1d   :  { %1041 = dma.done.wait [#allocation7], 576  }
  0x1e   :  { %1042 = vsyncadd [#allocation7], 4294966720 }
  0x1f   :  { %1043 = dma.done.wait [#allocation10], 1024  }
  0x20   :  { %1044 = vsyncadd [#allocation10], 4294966272 }
  0x21   :  { %1045 = dma.done.wait [#allocation13], 1024  }
  0x22   :  { %1046 = vsyncadd [#allocation13], 4294966272  ;;  %vm154_vm0 = vcmask 261120   ;;  %v152_v1 = vld [vmem:[#allocation3 + $0x10] sm:$0xff]  ;;  %v150_v2 = vld [vmem:[#allocation3] sm:$0xff]  ;;  %v1060_v9 = vmov 32.0  }
  0x23   :  { %v161_v3 = vsel %vm154_vm0, %v152_v1, 0.0  ;;  %v155_v4 = vsel %vm154_vm0, %v150_v2, 0.0  ;;  %v153_v5 = vld [vmem:[#allocation3 + $0x18] sm:$0xff]  ;;  %v151_v6 = vld [vmem:[#allocation3 + $0x8] sm:$0xff]  ;;  %819 = vrcp.f32 %v1060_v9  ;;  %vm497_vm14 = vcmask 64512   ;;  %s1062_s15 = smov [#allocation15]  }
  0x24   :  { %162 = vadd.xlane.f32.xlu1 %v161_v3  ;;  %156 = vadd.xlane.f32.xlu0 %v155_v4  ;;  %v164_v7 = vsel %vm154_vm0, %v153_v5, 0.0  ;;  %v158_v8 = vsel %vm154_vm0, %v151_v6, 0.0  ;;  %v269_v36 = vld [vmem:[#allocation8 + $0x18] sm:$0xff]  ;;  %v268_v39 = vld [vmem:[#allocation8 + $0x10] sm:$0xff]  ;;  %v267_v42 = vld [vmem:[#allocation8 + $0x8] sm:$0xff]  ;;  %s755_s16 = sshll.u32 %s1062_s15, 4  ;;  %s756_s16 = int_to_ptr.vmem [resolvable:$true] %s755_s16 }
  0x25   :  { %v314_v37 = vld [vmem:[#allocation9 + $0x18] sm:$0xff]  ;;  %294 = vmatpush.msra.mxu0 %v269_v36  ;;  %v313_v40 = vld [vmem:[#allocation9 + $0x10] sm:$0xff]  ;;  %v312_v43 = vld [vmem:[#allocation9 + $0x8] sm:$0xff]  ;;  %s757_s18 = sshll.u32 %s1260_s11, 4  ;;  %s758_s18 = int_to_ptr.hbm [resolvable:$true] %s757_s18 }
  0x26   :  { %v347_v38 = vld [vmem:[#allocation11 + $0x18] sm:$0xff]  ;;  %327 = vmatpush.msra.mxu1 %v314_v37  ;;  %v346_v41 = vld [vmem:[#allocation11 + $0x10] sm:$0xff]  ;;  %v345_v44 = vld [vmem:[#allocation11 + $0x8] sm:$0xff] }
  0x27   :  { %360 = vmatpush.msra.mxu2 %v347_v38  ;;  %295 = vmatpush.msra.mxu0 %v268_v39  ;;  %v266_v45 = vld [vmem:[#allocation8] sm:$0xff] }
  0x28   :  { %328 = vmatpush.msra.mxu1 %v313_v40  ;;  %v311_v46 = vld [vmem:[#allocation9] sm:$0xff] }
  0x29   :  { %v820_v10 = vpop.eup %819  ;;  %361 = vmatpush.msra.mxu2 %v346_v41  ;;  %296 = vmatpush.msra.mxu0 %v267_v42  ;;  %v344_v47 = vld [vmem:[#allocation11] sm:$0xff] }
  0x2a   :  { %v168_v11 = vmul.f32 32.0, %v820_v10  ;;  %vm172_vm1 = vweird.f32 %v820_v10  ;;  %329 = vmatpush.msra.mxu1 %v312_v43 }
  0x2b   :  { %362 = vmatpush.msra.mxu2 %v345_v44  ;;  %297 = vmatpush.msra.mxu0 %v266_v45 }
  0x2c   :  { %165 = vadd.xlane.f32.xlu1 %v164_v7  ;;  %159 = vadd.xlane.f32.xlu0 %v158_v8  ;;  %v169_v12 = vsub.f32 1.0, %v168_v11 }
  0x2d   :  { %330 = vmatpush.msra.mxu1 %v311_v46  ;;  %363 = vmatpush.msra.mxu2 %v344_v47 }
  0x2e   :  { %v170_v13 = vmul.f32 %v820_v10, %v169_v12 }
  0x30   :  { %v171_v14 = vadd.f32 %v820_v10, %v170_v13 }
  0x32   :  { %v173_v15 = vsel %vm172_vm1, %v820_v10, %v171_v14  ;;  %v812_v10 = vld [vmem:[%s1251_s2] ss:$0 sm:$0xff]  ;;  %vm682_vm1 = vcmask 1041409  }
  0x33   :  { %v813_v14 = vld [vmem:[%s1252_s3] ss:$0 sm:$0xff] }
  0x97   :  { %v163_v16 = vpop.xlane.xlu1 %162  ;;  %v157_v17 = vpop.xlane.xlu0 %156 }
  0x98   :  { %v176_v18 = vmul.f32 %v173_v15, %v163_v16  ;;  %v174_v19 = vmul.f32 %v173_v15, %v157_v17 }
  0x9a   :  { %v1169_v20 = vsub.f32 %v152_v1, %v176_v18  ;;  %v1171_v21 = vsub.f32 %v150_v2, %v174_v19 }
  0x9c   :  { %v184_v22 = vmul.f32 %v1169_v20, %v1169_v20  ;;  %v182_v23 = vmul.f32 %v1171_v21, %v1171_v21 }
  0x9e   :  { %v192_v24 = vsel %vm154_vm0, %v184_v22, 0.0  ;;  %v186_v25 = vsel %vm154_vm0, %v182_v23, 0.0 }
  0x9f   :  { %v166_v26 = vpop.xlane.xlu1 %165  ;;  %193 = vadd.xlane.f32.xlu0 %v192_v24  ;;  %187 = vadd.xlane.f32.xlu2 %v186_v25  ;;  %v160_v27 = vpop.xlane.xlu0 %159 }
  0xa0   :  { %v177_v28 = vmul.f32 %v173_v15, %v166_v26  ;;  %v175_v29 = vmul.f32 %v173_v15, %v160_v27 }
  0xa2   :  { %v1179_v30 = vsub.f32 %v153_v5, %v177_v28  ;;  %v1181_v31 = vsub.f32 %v151_v6, %v175_v29 }
  0xa4   :  { %v185_v32 = vmul.f32 %v1179_v30, %v1179_v30  ;;  %v183_v33 = vmul.f32 %v1181_v31, %v1181_v31 }
  0xa6   :  { %v195_v34 = vsel %vm154_vm0, %v185_v32, 0.0  ;;  %v189_v35 = vsel %vm154_vm0, %v183_v33, 0.0 }
  0xa7   :  { %196 = vadd.xlane.f32.xlu1 %v195_v34  ;;  %190 = vadd.xlane.f32.xlu2 %v189_v35 }
 0x112   :  { %v188_v48 = vpop.xlane.xlu2 %187  ;;  %v194_v49 = vpop.xlane.xlu0 %193 }
 0x113   :  { %v198_v50 = vmul.f32 %v188_v48, %v173_v15  ;;  %v200_v51 = vmul.f32 %v194_v49, %v173_v15 }
 0x115   :  { %v202_v52 = vadd.f32 1e-05, %v198_v50  ;;  %v204_v53 = vadd.f32 1e-05, %v200_v51  ;;  %v814_v51 = vld [vmem:[#allocation6] ss:$0 sm:$0xff] }
 0x117   :  { %821 = vrsqrt.f32 %v202_v52  ;;  %vm212_vm3 = vweird.f32 %v202_v52  ;;  %vm232_vm5 = vweird.f32 %v204_v53 }
 0x118   :  { %823 = vrsqrt.f32 %v204_v53 }
 0x11a   :  { %v197_v54 = vpop.xlane.xlu1 %196  ;;  %v191_v55 = vpop.xlane.xlu2 %190 }
 0x11b   :  { %v201_v56 = vmul.f32 %v197_v54, %v173_v15  ;;  %v199_v57 = vmul.f32 %v191_v55, %v173_v15  ;;  %v815_v55 = vld [vmem:[#allocation6 + $0x1] ss:$0 sm:$0xff] }
 0x11d   :  { %v822_v58 = vpop.eup %821  ;;  %v205_v59 = vadd.f32 1e-05, %v201_v56  ;;  %v203_v60 = vadd.f32 1e-05, %v199_v57 }
 0x11e   :  { %v824_v61 = vpop.eup %823  ;;  %v207_v62 = vmul.f32 %v822_v58, %v202_v52  ;;  %vm213_vm2 = vweird.f32 %v822_v58 }
 0x11f   :  { %v227_v63 = vmul.f32 %v824_v61, %v204_v53  ;;  %825 = vrsqrt.f32 %v205_v59  ;;  %vm214_vm4 = vmor %vm212_vm3, %vm213_vm2  ;;  %vm233_vm6 = vweird.f32 %v824_v61  ;;  %vm222_vm9 = vweird.f32 %v203_v60 }
 0x120   :  { %v208_v0 = vmul.f32 %v822_v58, %v207_v62  ;;  %827 = vrsqrt.f32 %v203_v60  ;;  %vm1196_vm8 = vmor %vm232_vm5, %vm233_vm6  ;;  %vm242_vm11 = vweird.f32 %v205_v59  ;;  %vm685_vm2 = vcmask 1042434  }
 0x121   :  { %v228_v2 = vmul.f32 %v824_v61, %v227_v63  ;;  %v817_v63 = vld [vmem:[#allocation6 + $0x3] ss:$0 sm:$0xff]  ;;  %vm688_vm3 = vcmask 1043459  }
 0x122   :  { %v209_v1 = vmul.f32 0.5, %v208_v0 }
 0x123   :  { %v229_v7 = vmul.f32 0.5, %v228_v2 }
 0x124   :  { %v210_v3 = vsub.f32 1.5, %v209_v1 }
 0x125   :  { %v826_v4 = vpop.eup %825  ;;  %v230_v15 = vsub.f32 1.5, %v229_v7 }
 0x126   :  { %v828_v5 = vpop.eup %827  ;;  %v211_v6 = vmul.f32 %v822_v58, %v210_v3  ;;  %v237_v8 = vmul.f32 %v826_v4, %v205_v59  ;;  %vm243_vm12 = vweird.f32 %v826_v4  ;;  %v816_v59 = vld [vmem:[#allocation6 + $0x2] ss:$0 sm:$0xff] }
 0x127   :  { %v217_v9 = vmul.f32 %v828_v5, %v203_v60  ;;  %vm223_vm7 = vweird.f32 %v828_v5  ;;  %v231_v23 = vmul.f32 %v824_v61, %v230_v15  ;;  %vm244_vm13 = vmor %vm242_vm11, %vm243_vm12 }
 0x128   :  { %v215_v11 = vsel %vm214_vm4, %v822_v58, %v211_v6  ;;  %v238_v16 = vmul.f32 %v826_v4, %v237_v8  ;;  %vm224_vm10 = vmor %vm222_vm9, %vm223_vm7 }
 0x129   :  { %v218_v12 = vmul.f32 %v828_v5, %v217_v9  ;;  %v246_v13 = vmul.f32 %v215_v11, %v1171_v21  ;;  %v235_v28 = vsel %vm1196_vm8, %v824_v61, %v231_v23 }
 0x12a   :  { %v239_v25 = vmul.f32 0.5, %v238_v16  ;;  %v248_v34 = vmul.f32 %v235_v28, %v1169_v20 }
 0x12b   :  { %v219_v17 = vmul.f32 0.5, %v218_v12  ;;  %v254_v18 = vmul.f32 %v812_v10, %v246_v13 }
 0x12c   :  { %v240_v29 = vsub.f32 1.5, %v239_v25  ;;  %v256_v36 = vmul.f32 %v812_v10, %v248_v34  ;;  %v1061_v25 = vmov 8.0  }
 0x12d   :  { %v220_v19 = vsub.f32 1.5, %v219_v17  ;;  %v262_v22 = vadd.f32 %v813_v14, %v254_v18 }
 0x12e   :  { %v241_v35 = vmul.f32 %v826_v4, %v240_v29  ;;  %v264_v37 = vadd.f32 %v813_v14, %v256_v36 }
 0x12f   :  { %v221_v21 = vmul.f32 %v828_v5, %v220_v19  ;;  %770 = vmatmul.msk.f32.vlgmr.msra.gmra.mxu0 %vm154_vm0, %v262_v22  ;;  %774 = vmatmul.msk.f32.vlgmr.msra.gmra.mxu1 %vm154_vm0, %v262_v22 }
 0x130   :  { %778 = vmatmul.msk.f32.vlgmr.msra.gmra.mxu2 %vm154_vm0, %v262_v22 }
 0x131   :  { %v225_v26 = vsel %vm224_vm10, %v828_v5, %v221_v21 }
 0x132   :  { %v247_v27 = vmul.f32 %v225_v26, %v1181_v31  ;;  %v245_v31 = vsel %vm244_vm13, %v826_v4, %v241_v35 }
 0x133   :  { %v249_v38 = vmul.f32 %v245_v31, %v1179_v30 }
 0x134   :  { %v255_v32 = vmul.f32 %v812_v10, %v247_v27 }
 0x135   :  { %v257_v20 = vmul.f32 %v812_v10, %v249_v38 }
 0x136   :  { %v263_v33 = vadd.f32 %v813_v14, %v255_v32 }
 0x137   :  { %v265_v39 = vadd.f32 %v813_v14, %v257_v20 }
 0x138   :  { %771 = vmatmul.msk.f32.gmra.mxu0 %vm154_vm0, %v263_v33  ;;  %775 = vmatmul.msk.f32.gmra.mxu1 %vm154_vm0, %v263_v33 }
 0x139   :  { %779 = vmatmul.msk.f32.gmra.mxu2 %vm154_vm0, %v263_v33 }
 0x140   :  { %772 = vmatmul.msk.f32.gmra.mxu0 %vm154_vm0, %v264_v37  ;;  %776 = vmatmul.msk.f32.gmra.mxu1 %vm154_vm0, %v264_v37 }
 0x141   :  { %780 = vmatmul.msk.f32.gmra.mxu2 %vm154_vm0, %v264_v37 }
 0x148   :  { %773 = vmatmul.msk.f32.gmra.mxu0 %vm154_vm0, %v265_v39  ;;  %777 = vmatmul.msk.f32.gmra.mxu1 %vm154_vm0, %v265_v39 }
 0x149   :  { %781 = vmatmul.msk.f32.gmra.mxu2 %vm154_vm0, %v265_v39 }
 0x1ac   :  { %v299_v40 = vpop.f32.mrf.mxu0  ;;  %v332_v41 = vpop.f32.mrf.mxu1 }
 0x1ad   :  { %782 = vmatpush.xpose.msk.msra.mxu3 %vm154_vm0, %v332_v41 }
 0x1b0   :  { %783 = vmatmul.msk.f32.vlgmr.msra.gmra.mxu3 %vm154_vm0, %v299_v40 }
 0x1b3   :  { %v365_v30 = vpop.f32.mrf.mxu2 }
 0x1b5   :  { %v302_v42 = vpop.f32.mrf.mxu0  ;;  %v335_v43 = vpop.f32.mrf.mxu1 }
 0x1b6   :  { %784 = vmatpush.xpose.msk.msrb.mxu3 %vm154_vm0, %v335_v43 }
 0x1b9   :  { %785 = vmatmul.msk.f32.vlgmr.msrb.gmra.mxu3 %vm154_vm0, %v302_v42 }
 0x1bc   :  { %v368_v44 = vpop.f32.mrf.mxu2 }
 0x1bd   :  { %622 = vmatpush.msrb.mxu0 %v368_v44  ;;  %v338_v45 = vpop.f32.mrf.mxu1  ;;  %v305_v46 = vpop.f32.mrf.mxu0 }
 0x1be   :  { %786 = vmatpush.xpose.msk.msra.mxu3 %vm154_vm0, %v338_v45 }
 0x1c1   :  { %787 = vmatmul.msk.f32.vlgmr.msra.gmra.mxu3 %vm154_vm0, %v305_v46 }
 0x1c4   :  { %v371_v47 = vpop.f32.mrf.mxu2 }
 0x1c5   :  { %645 = vmatpush.msrb.mxu1 %v371_v47  ;;  %v341_v48 = vpop.f32.mrf.mxu1  ;;  %v308_v49 = vpop.f32.mrf.mxu0 }
 0x1c6   :  { %788 = vmatpush.xpose.msk.msrb.mxu3 %vm154_vm0, %v341_v48 }
 0x1c9   :  { %789 = vmatmul.msk.f32.vlgmr.msrb.gmra.mxu3 %vm154_vm0, %v308_v49 }
 0x1ca   :  { %599 = vmatpush.msra.mxu3 %v365_v30 }
 0x1cc   :  { %v374_v50 = vpop.f32.mrf.mxu2 }
 0x1cd   :  { %668 = vmatpush.msrb.mxu2 %v374_v50 }
 0x233   :  { %v416_v52 = vpop.f32.mrf.mxu3 }
 0x234   :  { %v417_v53 = vadd.f32 %v814_v51, %v416_v52 }
 0x236   :  { %v498_v54 = vsel %vm497_vm14, %v417_v53, -inf }
 0x237   :  { %499 = vmax.xlane.f32.xlu2 %v498_v54 }
 0x23c   :  { %v442_v56 = vpop.f32.mrf.mxu3 }
 0x23d   :  { %v443_v57 = vadd.f32 %v815_v55, %v442_v56 }
 0x23f   :  { %v501_v58 = vsel %vm497_vm14, %v443_v57, -inf }
 0x240   :  { %502 = vmax.xlane.f32.xlu1 %v501_v58 }
 0x244   :  { %v468_v60 = vpop.f32.mrf.mxu3 }
 0x245   :  { %v469_v61 = vadd.f32 %v816_v59, %v468_v60 }
 0x247   :  { %v504_v62 = vsel %vm497_vm14, %v469_v61, -inf }
 0x248   :  { %505 = vmax.xlane.f32.xlu2 %v504_v62 }
 0x24c   :  { %v494_v0 = vpop.f32.mrf.mxu3 }
 0x24d   :  { %v495_v1 = vadd.f32 %v817_v63, %v494_v0 }
 0x24f   :  { %v507_v2 = vsel %vm497_vm14, %v495_v1, -inf }
 0x250   :  { %508 = vmax.xlane.f32.xlu0 %v507_v2 }
 0x2aa   :  { %v500_v3 = vpop.xlane.xlu2 %499 }
 0x2ab   :  { %v510_v4 = vsub.f32 %v417_v53, %v500_v3 }
 0x2ad   :  { %v514_v5 = vmul.f32 1.442695, %v510_v4 }
 0x2af   :  { %829 = vpow2.f32 %v514_v5 }
 0x2b3   :  { %v503_v6 = vpop.xlane.xlu1 %502 }
 0x2b4   :  { %v511_v7 = vsub.f32 %v443_v57, %v503_v6 }
 0x2b5   :  { %v830_v8 = vpop.eup %829 }
 0x2b6   :  { %v516_v9 = vmul.f32 1.442695, %v511_v7  ;;  %v522_v10 = vsel %vm497_vm14, %v830_v8, 0.0 }
 0x2b7   :  { %523 = vadd.xlane.f32.xlu0 %v522_v10  ;;  %v676_v10 = vld [vmem:[#allocation12 + $0x18] sm:$0xff] }
 0x2b8   :  { %831 = vpow2.f32 %v516_v9  ;;  %704 = vmatpush.msrb.mxu3 %v676_v10 }
 0x2bb   :  { %v506_v11 = vpop.xlane.xlu2 %505 }
 0x2bc   :  { %v512_v12 = vsub.f32 %v469_v61, %v506_v11  ;;  %v675_v11 = vld [vmem:[#allocation12 + $0x10] sm:$0xff] }
 0x2bd   :  { %705 = vmatpush.msrb.mxu3 %v675_v11 }
 0x2be   :  { %v832_v13 = vpop.eup %831  ;;  %v518_v14 = vmul.f32 1.442695, %v512_v12  ;;  %v674_v12 = vld [vmem:[#allocation12 + $0x8] sm:$0xff] }
 0x2bf   :  { %v525_v15 = vsel %vm497_vm14, %v832_v13, 0.0  ;;  %706 = vmatpush.msrb.mxu3 %v674_v12 }
 0x2c0   :  { %833 = vpow2.f32 %v518_v14  ;;  %526 = vadd.xlane.f32.xlu2 %v525_v15  ;;  %v712_v14 = vld [vmem:[#allocation2] sm:$0x1] }
 0x2c1   :  { %v721_v15 = vld [vmem:[#allocation14 + $0x18] sm:$0xff]  ;;  %796 = vpush %v712_v14 }
 0x2c2   :  { %741 = vmatpush.msra.mxu0 %v721_v15 }
 0x2c3   :  { %v509_v16 = vpop.xlane.xlu0 %508 }
 0x2c4   :  { %v513_v17 = vsub.f32 %v495_v1, %v509_v16  ;;  %v720_v16 = vld [vmem:[#allocation14 + $0x10] sm:$0xff] }
 0x2c5   :  { %742 = vmatpush.msra.mxu0 %v720_v16 }
 0x2c6   :  { %v834_v18 = vpop.eup %833  ;;  %v520_v19 = vmul.f32 1.442695, %v513_v17 }
 0x2c7   :  { %v528_v22 = vsel %vm497_vm14, %v834_v18, 0.0 }
 0x2c8   :  { %835 = vpow2.f32 %v520_v19  ;;  %529 = vadd.xlane.f32.xlu0 %v528_v22 }
 0x2c9   :  { %837 = vrcp.f32 %v1061_v25 }
 0x2ce   :  { %v836_v23 = vpop.eup %835 }
 0x2cf   :  { %v531_v24 = vsel %vm497_vm14, %v836_v23, 0.0  ;;  %v838_v26 = vpop.eup %837 }
 0x2d0   :  { %532 = vadd.xlane.f32.xlu1 %v531_v24  ;;  %v571_v27 = vmul.f32 8.0, %v838_v26  ;;  %vm575_vm15 = vweird.f32 %v838_v26 }
 0x2d2   :  { %v572_v32 = vsub.f32 1.0, %v571_v27 }
 0x2d4   :  { %v573_v36 = vmul.f32 %v838_v26, %v572_v32 }
 0x2d6   :  { %v574_v20 = vadd.f32 %v838_v26, %v573_v36  ;;  %v818_v36 = vld [vmem:[%s1259_s10] ss:$0 sm:$0xff] }
 0x2d8   :  { %v576_v44 = vsel %vm575_vm15, %v838_v26, %v574_v20 }
 0x2f2   :  { %s797_s2 = spop %796 }
 0x2f3   :  { %v715_v32 = vstv %s797_s2 }
 0x32a   :  { %v524_v21 = vpop.xlane.xlu0 %523 }
 0x32b   :  { %839 = vrcp.f32 %v524_v21 }
 0x331   :  { %v840_v28 = vpop.eup %839 }
 0x332   :  { %v538_v29 = vmul.f32 %v840_v28, %v830_v8  ;;  %v719_v28 = vld [vmem:[#allocation14 + $0x8] sm:$0xff] }
 0x333   :  { %v527_v33 = vpop.xlane.xlu2 %526  ;;  %743 = vmatpush.msra.mxu0 %v719_v28 }
 0x334   :  { %v542_v34 = vsel %vm497_vm14, %v538_v29, 0.0  ;;  %841 = vrcp.f32 %v527_v33  ;;  %v718_v29 = vld [vmem:[#allocation14] sm:$0xff] }
 0x335   :  { %v543_v35 = vrot.slane %v542_v34, 4  ;;  %744 = vmatpush.msra.mxu0 %v718_v29 }
 0x337   :  { %v544_v31 = vadd.f32 %v543_v35, %v542_v34 }
 0x339   :  { %v545_v37 = vrot.slane %v544_v31, 2 }
 0x33a   :  { %v842_v38 = vpop.eup %841 }
 0x33b   :  { %v546_v39 = vadd.f32 %v545_v37, %v544_v31  ;;  %v539_v40 = vmul.f32 %v842_v38, %v832_v13  ;;  %v530_v41 = vpop.xlane.xlu0 %529  ;;  %v673_v13 = vld [vmem:[#allocation12] sm:$0xff] }
 0x33c   :  { %843 = vrcp.f32 %v530_v41  ;;  %707 = vmatpush.msrb.mxu3 %v673_v13 }
 0x33d   :  { %v547_v30 = vrot.slane %v546_v39, 1  ;;  %v549_v42 = vsel %vm497_vm14, %v539_v40, 0.0 }
 0x33e   :  { %v550_v43 = vrot.slane %v549_v42, 4 }
 0x33f   :  { %v548_v45 = vadd.f32 %v547_v30, %v546_v39 }
 0x340   :  { %v551_v46 = vadd.f32 %v550_v43, %v549_v42 }
 0x341   :  { %v577_v47 = vmul.f32 %v576_v44, %v548_v45 }
 0x342   :  { %v844_v48 = vpop.eup %843  ;;  %v552_v49 = vrot.slane %v551_v46, 2 }
 0x343   :  { %v540_v50 = vmul.f32 %v844_v48, %v834_v18  ;;  %v533_v51 = vpop.xlane.xlu1 %532  ;;  %790 = vmatmul.msk.f32.vlgmr.msra.gmra.mxu3 %vm497_vm14, %v577_v47 }
 0x344   :  { %845 = vrcp.f32 %v533_v51  ;;  %v553_v52 = vadd.f32 %v552_v49, %v551_v46 }
 0x345   :  { %v556_v53 = vsel %vm497_vm14, %v540_v50, 0.0 }
 0x346   :  { %v557_v54 = vrot.slane %v556_v53, 4  ;;  %v554_v55 = vrot.slane %v553_v52, 1 }
 0x348   :  { %v558_v56 = vadd.f32 %v557_v54, %v556_v53  ;;  %v555_v57 = vadd.f32 %v554_v55, %v553_v52 }
 0x34a   :  { %v846_v58 = vpop.eup %845  ;;  %v559_v59 = vrot.slane %v558_v56, 2  ;;  %v578_v60 = vmul.f32 %v576_v44, %v555_v57 }
 0x34b   :  { %v541_v61 = vmul.f32 %v846_v58, %v836_v23 }
 0x34c   :  { %791 = vmatmul.msk.f32.vlgmr.msrb.gmra.mxu0 %vm497_vm14, %v578_v60  ;;  %v560_v62 = vadd.f32 %v559_v59, %v558_v56 }
 0x34d   :  { %v563_v63 = vsel %vm497_vm14, %v541_v61, 0.0 }
 0x34e   :  { %v564_v0 = vrot.slane %v563_v63, 4  ;;  %v561_v1 = vrot.slane %v560_v62, 1 }
 0x350   :  { %v565_v2 = vadd.f32 %v564_v0, %v563_v63  ;;  %v562_v3 = vadd.f32 %v561_v1, %v560_v62 }
 0x352   :  { %v566_v4 = vrot.slane %v565_v2, 2  ;;  %v579_v5 = vmul.f32 %v576_v44, %v562_v3 }
 0x354   :  { %792 = vmatmul.msk.f32.vlgmr.msrb.gmra.mxu1 %vm497_vm14, %v579_v5  ;;  %v567_v6 = vadd.f32 %v566_v4, %v565_v2 }
 0x356   :  { %v568_v7 = vrot.slane %v567_v6, 1 }
 0x358   :  { %v569_v8 = vadd.f32 %v568_v7, %v567_v6 }
 0x35a   :  { %v580_v9 = vmul.f32 %v576_v44, %v569_v8 }
 0x35c   :  { %793 = vmatmul.msk.f32.vlgmr.msrb.gmra.mxu2 %vm497_vm14, %v580_v9 }
 0x3c6   :  { %v601_v23 = vpop.f32.mrf.mxu3 }
 0x3c9   :  { %v624_v17 = vpop.f32.mrf.mxu0 }
 0x3ca   :  { %v681_v19 = vrot.slane %v624_v17, 7 }
 0x3cc   :  { %v683_v25 = vsel %vm682_vm1, %v681_v19, %v601_v23 }
 0x3d1   :  { %v647_v18 = vpop.f32.mrf.mxu1 }
 0x3d2   :  { %v684_v22 = vrot.slane %v647_v18, 6 }
 0x3d4   :  { %v686_v26 = vsel %vm685_vm2, %v684_v22, %v683_v25 }
 0x3df   :  { %v670_v24 = vpop.f32.mrf.mxu2 }
 0x3e0   :  { %v687_v21 = vrot.slane %v670_v24, 5 }
 0x3e2   :  { %v689_v27 = vsel %vm688_vm3, %v687_v21, %v686_v26 }
 0x3e3   :  { %794 = vmatmul.msk.f32.vlgmr.msrb.gmra.mxu3 %vm154_vm0, %v689_v27 }
 0x466   :  { %v709_v33 = vpop.f32.mrf.mxu3 }
 0x467   :  { %vm714_vm4 = vcmp.ge.f32.partialorder %v709_v33, 0.0  ;;  %v716_v34 = vmul.f32 %v715_v32, %v709_v33 }
 0x469   :  { %v717_v35 = vsel %vm714_vm4, %v709_v33, %v716_v34 }
 0x46a   :  { %795 = vmatmul.msk.f32.vlgmr.msra.gmra.mxu0 %vm154_vm0, %v717_v35 }
 0x4e7   :  { %v746_v31 = vpop.f32.mrf.mxu0 }
 0x4e8   :  { %v747_v37 = vadd.f32 %v818_v36, %v746_v31 }
 0x4ea   :  { %749 = vst [vmem:[#allocation15] sm:$0xf] %v747_v37 }
 0x4eb   :  { %760 = dma.vmem_to_hbm [thread:$0]  %s756_s16, 64, %s758_s18, [#allocation5]  }
 0x4ec   :  { %1047 = dma.done.wait [#allocation5], 64  }
 0x4ed   :  { %1048 = vsyncadd [#allocation5], 4294967232 }
 0x4ee   :  { %765 = vsyncpa [#allocation4], 1 }
 0x4ef   :  { %766 = vsyncpa [#allocation7], 1 }
 0x4f0   :  { %767 = vsyncpa [#allocation10], 1 }
 0x4f1   :  { %768 = vsyncpa [#allocation13], 1 }
 0x4f2   :  { %769 = vsyncpa [#allocation5], 1 }

</bundles_post_ra>
